<compile_context>
chip_gen: v7x
topology: tpu7x:2x2x1
jax: 0.10.0
libtpu: 0.0.40
codegen_flags: <defaults>
</compile_context>

<pallas_src>
import functools

import jax
import jax.numpy as jnp
from jax.experimental import pallas as pl
from jax.experimental.pallas import tpu as pltpu


_SUBLANE = 8
_STEP_TARGET_BYTES = 3 * 1024 * 1024   # ~3 MiB of raw input per grid step


def _round_up(x, m):
    return ((x + m - 1) // m) * m


def _hinge_loss_kernel(f_ref, y_ref, o_ref, *, margin, squared, batch, tm, nb_inner):
    c = pl.program_id(0)          # TensorCore split axis ("parallel")
    i = pl.program_id(2)          # row-block reduction axis ("arbitrary", innermost)

    # Zero this (split, lane-chunk) accumulator at the start of its row sweep.
    @pl.when(i == 0)
    def _():
        o_ref[...] = jnp.zeros_like(o_ref)

    f = f_ref[...].astype(jnp.float32)
    y = y_ref[...].astype(jnp.float32)

    y_new = 2.0 * y - 1.0
    loss = jnp.maximum(margin - y_new * f, 0.0)
    if squared:
        loss = loss * loss

    def accumulate(tile):
        # Fold tm rows into 8 sublane rows with pure VPU vreg adds; the single
        # full cross-lane reduce + mean is done once in the wrapper.
        part = tile.reshape(tm // _SUBLANE, _SUBLANE, tile.shape[-1]).sum(axis=0)
        o_ref[...] += part[None, :, :]

    # UNCLAMPED logical row offset.  This both (a) masks overhanging rows of
    # the genuine last block and (b) fully zeroes the duplicated tail block the
    # second core sees when nblocks is odd (its DMA index is clamped in the
    # index_map, but its logical row0 is >= batch).
    row0 = (c * nb_inner + i) * tm
    needs_mask = row0 + tm > batch

    @pl.when(jnp.logical_not(needs_mask))
    def _():
        accumulate(loss)                                  # fast path: no mask ops

    @pl.when(needs_mask)
    def _():
        row_idx = row0 + jax.lax.broadcasted_iota(jnp.int32, loss.shape, 0)
        # Keep this a select (not a multiply): padded rows may hold garbage/NaN.
        accumulate(jnp.where(row_idx < batch, loss, 0.0))


def hinge_loss(f, y, *, margin=1.0, squared=True, tm=None,
               vmem_limit_bytes=48 * 1024 * 1024):
    """Pallas TPU implementation of HingeLoss.forward. Returns a float32 scalar.

    f, y are read in their native dtypes (supply bf16 upstream if you want the
    halved HBM traffic; do NOT cast here in the wrapper).
    """
    assert f.shape == y.shape and f.ndim == 2
    B, D = f.shape

    fb, yb = f.dtype.itemsize, y.dtype.itemsize
    in_bpe = fb + yb                 # raw input bytes per element
    work_bpe = 2 * in_bpe + 12       # 2x double-buffered inputs + f32 temporaries

    vmem_budget = (vmem_limit_bytes * 3) // 4

    # --- row tile: ~3 MiB of raw input per grid step, VMEM-capped ------------
    if tm is None:
        tm = _STEP_TARGET_BYTES // (D * in_bpe)
    tm_cap = max(16, ((vmem_budget // (D * work_bpe)) // 16) * 16)
    tm = max(16, min(_round_up(tm, 16), tm_cap, _round_up(B, 16)))

    nblocks = pl.cdiv(B, tm)

    # --- unconditional 2-way TensorCore split when there is >1 row block -----
    nsplit = 2 if nblocks >= 2 else 1
    nb_inner = pl.cdiv(nblocks, nsplit)

    # --- lane (D) tiling: restore pipelining for small-B / large-D shapes and
    #     keep the per-step working set inside the VMEM budget ----------------
    td, nd = D, 1

    def _fits(t):
        return tm * t * work_bpe <= vmem_budget

    if D % 128 == 0 and D > 128 and (nb_inner < 4 or not _fits(D)):
        want_nd = max(2, -(-4 // nb_inner)) if nb_inner < 4 else 1
        for cand in range(D - 128, 0, -128):     # descending multiples of 128
            if D % cand:
                continue
            if D // cand >= want_nd and _fits(cand):
                td, nd = cand, D // cand
                break
        else:
            td, nd = 128, D // 128               # most-chunked fallback

    kernel = functools.partial(
        _hinge_loss_kernel,
        margin=float(margin),
        squared=bool(squared),
        batch=B,
        tm=tm,
        nb_inner=nb_inner,
    )

    def in_map(c, j, i):
        # Clamp so the duplicated tail block (odd nblocks, second split) stays
        # in bounds; its rows are zeroed by the in-kernel mask.
        return (jnp.minimum(c * nb_inner + i, nblocks - 1), j)

    partials = pl.pallas_call(
        kernel,
        out_shape=jax.ShapeDtypeStruct((nsplit, _SUBLANE, D), jnp.float32),
        grid_spec=pltpu.PrefetchScalarGridSpec(
            num_scalar_prefetch=0,
            grid=(nsplit, nd, nb_inner),
            in_specs=[
                pl.BlockSpec((tm, td), in_map),
                pl.BlockSpec((tm, td), in_map),
            ],
            out_specs=pl.BlockSpec((1, _SUBLANE, td), lambda c, j, i: (c, 0, j)),
        ),
        compiler_params=pltpu.CompilerParams(
            dimension_semantics=("parallel", "parallel", "arbitrary"),
            vmem_limit_bytes=vmem_limit_bytes,
        ),
    )(f, y)

    # Single cross-lane/sublane reduction + mean, done once outside the kernel.
    # Divide by B then D (each exact in f32 up to 2^24) rather than by B*D.
    return jnp.sum(partials) / jnp.float32(B) / jnp.float32(D)


def hinge_loss_ref(f, y, *, margin=1.0, squared=True):
    f = f.astype(jnp.float32)
    y = y.astype(jnp.float32)
    y_new = 2.0 * y - 1.0
    loss = jnp.maximum(margin - y_new * f, 0.0)
    if squared:
        loss = loss * loss
    return jnp.mean(loss)


if __name__ == "__main__":
    key = jax.random.PRNGKey(0)
    k1, k2, k3, k4, k5, k6, k7, k8 = jax.random.split(key, 8)

    # 1) Small canonical shape (batch_size x output_size), f32 scores, f32 0/1 labels.
    B1, D1 = 16, 128
    f1 = jax.random.normal(k1, (B1, D1), dtype=jnp.float32)
    y1 = (jax.random.uniform(k2, (B1, D1)) > 0.5).astype(jnp.float32)
    out1 = jax.block_until_ready(hinge_loss(f1, y1, margin=1.0, squared=True))
    ref1 = hinge_loss_ref(f1, y1, margin=1.0, squared=True)
    assert jnp.allclose(out1, ref1, rtol=1e-5, atol=1e-6), (out1, ref1)

    # 2) Ragged batch, even block count, 2-way split; caller-supplied bf16 labels.
    B2, D2 = 500, 128
    f2 = jax.random.normal(k3, (B2, D2), dtype=jnp.float32)
    y2 = (jax.random.uniform(k4, (B2, D2)) > 0.5).astype(jnp.bfloat16)
    out2 = jax.block_until_ready(hinge_loss(f2, y2, margin=1.0, squared=True, tm=64))
    ref2 = hinge_loss_ref(f2, y2, margin=1.0, squared=True)
    assert jnp.allclose(out2, ref2, rtol=1e-5, atol=1e-6), (out2, ref2)

    # 3) Odd block count: exercises the clamped, fully-masked duplicate tail block.
    B3, D3 = 300, 128
    f3 = jax.random.normal(k5, (B3, D3), dtype=jnp.float32)
    y3 = (jax.random.uniform(k6, (B3, D3)) > 0.5).astype(jnp.float32)
    out3 = jax.block_until_ready(hinge_loss(f3, y3, margin=1.0, squared=True, tm=64))
    ref3 = hinge_loss_ref(f3, y3, margin=1.0, squared=True)
    assert jnp.allclose(out3, ref3, rtol=1e-5, atol=1e-6), (out3, ref3)

    # 4) Small block count + wider D: exercises the lane-tiling path, squared=False.
    B4, D4 = 200, 512
    f4 = jax.random.normal(k7, (B4, D4), dtype=jnp.float32)
    y4 = (jax.random.uniform(k8, (B4, D4)) > 0.5).astype(jnp.float32)
    out4 = jax.block_until_ready(hinge_loss(f4, y4, margin=0.5, squared=False, tm=64))
    ref4 = hinge_loss_ref(f4, y4, margin=0.5, squared=False)
    assert jnp.allclose(out4, ref4, rtol=1e-5, atol=1e-6), (out4, ref4)

    print("KERNEL_OK")
</pallas_src>

<mosaic_0001>
module attributes {stable_mosaic.version = 11 : i64} {
  func.func @_hinge_loss_kernel(%arg0: i32, %arg1: i32, %arg2: i32, %arg3: memref<16x128xf32, #tpu.memory_space<vmem>>, %arg4: memref<16x128xf32, #tpu.memory_space<vmem>>, %arg5: memref<1x8x128xf32, #tpu.memory_space<vmem>>) attributes {dimension_semantics = [#tpu.dimension_semantics<parallel>, #tpu.dimension_semantics<parallel>, #tpu.dimension_semantics<arbitrary>], iteration_bounds = array<i64: 1, 1, 1>, scalar_prefetch = 0 : i64, scratch_operands = 0 : i64, tpu.core_type = #tpu.core_type<tc>, window_params = [{transform_indices = @transform_0, window_bounds = array<i64: 16, 128>}, {transform_indices = @transform_1, window_bounds = array<i64: 16, 128>}, {transform_indices = @transform_2, window_bounds = array<i64: 1, 8, 128>}]} {
    %c0_i32 = arith.constant 0 : i32
    %0 = arith.cmpi eq, %arg2, %c0_i32 : i32
    %1 = arith.extui %0 : i1 to i32
    %c0_i32_0 = arith.constant 0 : i32
    %2 = arith.cmpi ne, %1, %c0_i32_0 : i32
    scf.if %2 {
      %cst_11 = arith.constant 0.000000e+00 : f32
      %25 = vector.broadcast %cst_11 : f32 to vector<1x8x128xf32>
      %c0_12 = arith.constant 0 : index
      %c0_13 = arith.constant 0 : index
      %c0_14 = arith.constant 0 : index
      %26 = vector.load %arg5[%c0_12, %c0_13, %c0_14] : memref<1x8x128xf32, #tpu.memory_space<vmem>>, vector<1x8x128xf32>
      tpu.vector_store %arg5[%c0_12, %c0_13, %c0_14], %25 {strides = array<i32>} : memref<1x8x128xf32, #tpu.memory_space<vmem>>, vector<1x8x128xf32>,
    } else {
    }
    %c0 = arith.constant 0 : index
    %c0_1 = arith.constant 0 : index
    %3 = vector.load %arg3[%c0, %c0_1] : memref<16x128xf32, #tpu.memory_space<vmem>>, vector<16x128xf32>
    %c0_2 = arith.constant 0 : index
    %c0_3 = arith.constant 0 : index
    %4 = vector.load %arg4[%c0_2, %c0_3] : memref<16x128xf32, #tpu.memory_space<vmem>>, vector<16x128xf32>
    %cst = arith.constant 2.000000e+00 : f32
    %5 = vector.broadcast %cst : f32 to vector<16x128xf32>
    %6 = arith.mulf %5, %4 : vector<16x128xf32>
    %cst_4 = arith.constant 1.000000e+00 : f32
    %7 = vector.broadcast %cst_4 : f32 to vector<16x128xf32>
    %8 = arith.subf %6, %7 : vector<16x128xf32>
    %9 = arith.mulf %8, %3 : vector<16x128xf32>
    %cst_5 = arith.constant 1.000000e+00 : f32
    %10 = vector.broadcast %cst_5 : f32 to vector<16x128xf32>
    %11 = arith.subf %10, %9 : vector<16x128xf32>
    %cst_6 = arith.constant 0.000000e+00 : f32
    %12 = vector.broadcast %cst_6 : f32 to vector<16x128xf32>
    %13 = arith.maximumf %11, %12 : vector<16x128xf32>
    %14 = arith.mulf %13, %13 : vector<16x128xf32>
    %c1_i32 = arith.constant 1 : i32
    %15 = arith.muli %arg0, %c1_i32 : i32
    %16 = arith.addi %15, %arg2 : i32
    %c16_i32 = arith.constant 16 : i32
    %17 = arith.muli %16, %c16_i32 : i32
    %c16_i32_7 = arith.constant 16 : i32
    %18 = arith.addi %17, %c16_i32_7 : i32
    %c16_i32_8 = arith.constant 16 : i32
    %19 = arith.cmpi sgt, %18, %c16_i32_8 : i32
    %true = arith.constant true
    %20 = arith.xori %19, %true : i1
    %21 = arith.extui %20 : i1 to i32
    %c0_i32_9 = arith.constant 0 : i32
    %22 = arith.cmpi ne, %21, %c0_i32_9 : i32
    scf.if %22 {
      %25 = vector.shape_cast %14 : vector<16x128xf32> to vector<2x8x128xf32>
      %cst_11 = arith.constant dense<0.000000e+00> : vector<8x128xf32>
      %26 = vector.multi_reduction <add>, %25, %cst_11 [0] : vector<2x8x128xf32> to vector<8x128xf32>
      %c0_12 = arith.constant 0 : index
      %c0_13 = arith.constant 0 : index
      %c0_14 = arith.constant 0 : index
      %27 = vector.load %arg5[%c0_12, %c0_13, %c0_14] : memref<1x8x128xf32, #tpu.memory_space<vmem>>, vector<1x8x128xf32>
      %28 = vector.shape_cast %26 : vector<8x128xf32> to vector<1x8x128xf32>
      %29 = arith.addf %27, %28 : vector<1x8x128xf32>
      %c0_15 = arith.constant 0 : index
      %c0_16 = arith.constant 0 : index
      %c0_17 = arith.constant 0 : index
      %30 = vector.load %arg5[%c0_15, %c0_16, %c0_17] : memref<1x8x128xf32, #tpu.memory_space<vmem>>, vector<1x8x128xf32>
      tpu.vector_store %arg5[%c0_15, %c0_16, %c0_17], %29 {strides = array<i32>} : memref<1x8x128xf32, #tpu.memory_space<vmem>>, vector<1x8x128xf32>,
    } else {
    }
    %23 = arith.extui %19 : i1 to i32
    %c0_i32_10 = arith.constant 0 : i32
    %24 = arith.cmpi ne, %23, %c0_i32_10 : i32
    scf.if %24 {
      %25 = tpu.iota {dimensions = array<i32: 0>} : vector<16x128xi32>
      %26 = vector.broadcast %17 : i32 to vector<16x128xi32>
      %27 = arith.addi %26, %25 : vector<16x128xi32>
      %c16_i32_11 = arith.constant 16 : i32
      %28 = vector.broadcast %c16_i32_11 : i32 to vector<16x128xi32>
      %29 = arith.cmpi slt, %27, %28 : vector<16x128xi32>
      %cst_12 = arith.constant 0.000000e+00 : f32
      %30 = vector.broadcast %cst_12 : f32 to vector<16x128xf32>
      %31 = arith.select %29, %14, %30 : vector<16x128xi1>, vector<16x128xf32>
      %32 = vector.shape_cast %31 : vector<16x128xf32> to vector<2x8x128xf32>
      %cst_13 = arith.constant dense<0.000000e+00> : vector<8x128xf32>
      %33 = vector.multi_reduction <add>, %32, %cst_13 [0] : vector<2x8x128xf32> to vector<8x128xf32>
      %c0_14 = arith.constant 0 : index
      %c0_15 = arith.constant 0 : index
      %c0_16 = arith.constant 0 : index
      %34 = vector.load %arg5[%c0_14, %c0_15, %c0_16] : memref<1x8x128xf32, #tpu.memory_space<vmem>>, vector<1x8x128xf32>
      %35 = vector.shape_cast %33 : vector<8x128xf32> to vector<1x8x128xf32>
      %36 = arith.addf %34, %35 : vector<1x8x128xf32>
      %c0_17 = arith.constant 0 : index
      %c0_18 = arith.constant 0 : index
      %c0_19 = arith.constant 0 : index
      %37 = vector.load %arg5[%c0_17, %c0_18, %c0_19] : memref<1x8x128xf32, #tpu.memory_space<vmem>>, vector<1x8x128xf32>
      tpu.vector_store %arg5[%c0_17, %c0_18, %c0_19], %36 {strides = array<i32>} : memref<1x8x128xf32, #tpu.memory_space<vmem>>, vector<1x8x128xf32>,
    } else {
    }
    return
  }
  func.func @transform_0(%arg0: i32, %arg1: i32, %arg2: i32) -> (i32, i32) {
    %c1_i32 = arith.constant 1 : i32
    %0 = arith.muli %arg0, %c1_i32 : i32
    %1 = arith.addi %0, %arg2 : i32
    %c0_i32 = arith.constant 0 : i32
    %2 = arith.minsi %1, %c0_i32 : i32
    %c0_i32_0 = arith.constant 0 : i32
    return %2, %arg1 : i32, i32
  }
  func.func @transform_1(%arg0: i32, %arg1: i32, %arg2: i32) -> (i32, i32) {
    %c1_i32 = arith.constant 1 : i32
    %0 = arith.muli %arg0, %c1_i32 : i32
    %1 = arith.addi %0, %arg2 : i32
    %c0_i32 = arith.constant 0 : i32
    %2 = arith.minsi %1, %c0_i32 : i32
    %c0_i32_0 = arith.constant 0 : i32
    return %2, %arg1 : i32, i32
  }
  func.func @transform_2(%arg0: i32, %arg1: i32, %arg2: i32) -> (i32, i32, i32) {
    %c0_i32 = arith.constant 0 : i32
    %c0_i32_0 = arith.constant 0 : i32
    return %arg0, %c0_i32, %arg1 : i32, i32, i32
  }
}

</mosaic_0001>

<bundles_post_ra>
// kernel: tpu_custom_call.1
= control target key start
LH: loop header
LB: loop body
LE: loop exit
PB: predicated region body
PF: predicated region fallthrough
CT: control target
= control target key end

     0   :  { %7 = vsyncpa [#allocation3], 0  ;;  %s266_s0 = inlined_call_operand.hbm [shape: f32[16,128], index: 0, kind: input, shape index: {}]   ;;  %s267_s1 = inlined_call_operand.hbm [shape: f32[16,128], index: 1, kind: input, shape index: {}]   ;;  %s268_s2 = inlined_call_operand.hbm [shape: f32[1,8,128], index: 2, kind: output, shape index: {}]  }
   0x1   :  { %8 = vsyncpa [#allocation6], 0 }
   0x2   :  { %9 = vsyncpa [#allocation4], 0  ;;  %s210_s9 = smov [#allocation2]   ;;  %s138_s13 = scalar_lea.hbm %s266_s0, 256 }
   0x3   :  { %s21_s10 = sshll.u32 %s210_s9, 4  ;;  %p139_p0 = scmp.ne.s32.totalorder %s266_s0, %s138_s13  ;;  %s22_s10 = int_to_ptr.vmem [resolvable:$true] %s21_s10 }
   0x4   :  { %p142_p1 = scmp.lt.u32.totalorder %s138_s13, %s266_s0 }
   0x6   :  { %p144_p2 = pnand %p142_p1, %p139_p0 }
   0x8   :  { %147 = shalt.err (!%p144_p2)
}
   0x9   :  { %s148_s18 = scalar_lea.vmem %s22_s10, 256  ;;  %p153_p4 = scmp.lt.s32.totalorder %s22_s10, %s22_s10 }
   0xa   :  { %p149_p3 = scmp.ne.s32.totalorder %s22_s10, %s148_s18  ;;  %p154_p5 = scmp.lt.s32.totalorder %s148_s18, %s148_s18 }
   0xc   :  { %p155_p6 = por %p154_p5, %p153_p4 }
   0xe   :  { %p156_p7 = pnand %p155_p6, %p149_p3 }
  0x10   :  { %159 = shalt.err (!%p156_p7)
}
  0x11   :  { %s211_s19 = smov 128   ;;  %s212_s20 = smov 8  }
  0x12   :  { %27 = dma.hbm_to_vmem [thread:$0]  %s266_s0, 256, %s22_s10, [#allocation3], %s211_s19, %s211_s19, %s212_s20  }
  0x13   :  { %s213_s23 = smov [#allocation5]   ;;  %s160_s27 = scalar_lea.hbm %s267_s1, 256 }
  0x14   :  { %s39_s24 = sshll.u32 %s213_s23, 4  ;;  %p161_p8 = scmp.ne.s32.totalorder %s267_s1, %s160_s27  ;;  %s40_s24 = int_to_ptr.vmem [resolvable:$true] %s39_s24 }
  0x15   :  { %p164_p9 = scmp.lt.u32.totalorder %s160_s27, %s267_s1 }
  0x17   :  { %p166_p10 = pnand %p164_p9, %p161_p8 }
  0x19   :  { %169 = shalt.err (!%p166_p10)
}
  0x1a   :  { %s170_s4 = scalar_lea.vmem %s40_s24, 256  ;;  %p175_p12 = scmp.lt.s32.totalorder %s40_s24, %s40_s24 }
  0x1b   :  { %p171_p11 = scmp.ne.s32.totalorder %s40_s24, %s170_s4  ;;  %p176_p13 = scmp.lt.s32.totalorder %s170_s4, %s170_s4 }
  0x1d   :  { %p177_p0 = por %p176_p13, %p175_p12 }
  0x1f   :  { %p178_p1 = pnand %p177_p0, %p171_p11 }
  0x21   :  { %181 = shalt.err (!%p178_p1)
}
  0x22   :  { %45 = dma.hbm_to_vmem [thread:$0]  %s267_s1, 256, %s40_s24, [#allocation6], %s211_s19, %s211_s19, %s212_s20  }
  0x23   :  { %204 = dma.done.wait [#allocation3], 256  }
  0x24   :  { %205 = vsyncadd [#allocation3], 4294967040 }
  0x25   :  { %206 = dma.done.wait [#allocation6], 256  }
  0x26   :  { %207 = vsyncadd [#allocation6], 4294967040  ;;  %v67_v0 = vld [vmem:[#allocation5] sm:$0xff]  ;;  %v68_v1 = vld [vmem:[#allocation5 + $0x8] sm:$0xff]  ;;  %s214_s1 = smov [#allocation7]  }
  0x27   :  { %v69_v2 = vmul.f32 2.0, %v67_v0  ;;  %v65_v3 = vld [vmem:[#allocation2] sm:$0xff]  ;;  %v70_v4 = vmul.f32 2.0, %v68_v1  ;;  %v66_v5 = vld [vmem:[#allocation2 + $0x8] sm:$0xff]  ;;  %s116_s6 = sshll.u32 %s214_s1, 4  ;;  %s117_s6 = int_to_ptr.vmem [resolvable:$true] %s116_s6 }
  0x28   :  { %s182_s7 = scalar_lea.vmem %s117_s6, 128  ;;  %p187_p3 = scmp.lt.s32.totalorder %s117_s6, %s117_s6 }
  0x29   :  { %v130_v6 = vadd.f32 -1.0, %v69_v2  ;;  %v131_v7 = vadd.f32 -1.0, %v70_v4  ;;  %p183_p2 = scmp.ne.s32.totalorder %s117_s6, %s182_s7  ;;  %p188_p4 = scmp.lt.s32.totalorder %s182_s7, %s182_s7 }
  0x2b   :  { %v73_v8 = vmul.f32 %v130_v6, %v65_v3  ;;  %v74_v9 = vmul.f32 %v131_v7, %v66_v5  ;;  %p189_p5 = por %p188_p4, %p187_p3 }
  0x2d   :  { %v75_v10 = vsub.f32 1.0, %v73_v8  ;;  %v76_v11 = vsub.f32 1.0, %v74_v9  ;;  %p190_p6 = pnand %p189_p5, %p183_p2 }
  0x2f   :  { %v77_v12 = vmax.f32 %v75_v10, 0.0  ;;  %v78_v13 = vmax.f32 %v76_v11, 0.0 }
  0x31   :  { %v79_v14 = vmul.f32 %v77_v12, %v77_v12  ;;  %v80_v15 = vmul.f32 %v78_v13, %v78_v13 }
  0x33   :  { %v89_v16 = vadd.f32 %v80_v15, %v79_v14 }
  0x35   :  { %92 = vst [vmem:[#allocation7] sm:$0xff] %v89_v16 }
  0x36   :  { %193 = shalt.err (!%p190_p6)
}
  0x37   :  { %s194_s10 = scalar_lea.hbm %s268_s2, 128 }
  0x38   :  { %p195_p7 = scmp.ne.s32.totalorder %s268_s2, %s194_s10  ;;  %p198_p8 = scmp.lt.u32.totalorder %s194_s10, %s268_s2 }
  0x3a   :  { %p200_p9 = pnand %p198_p8, %p195_p7 }
  0x3c   :  { %203 = shalt.err (!%p200_p9)
}
  0x3d   :  { %119 = dma.vmem_to_hbm [thread:$0]  %s117_s6, 128, %s268_s2, [#allocation4]  }
  0x3e   :  { %208 = dma.done.wait [#allocation4], 128  }
  0x3f   :  { %209 = vsyncadd [#allocation4], 4294967168 }
  0x40   :  { %123 = vsyncpa [#allocation3], 1 }
  0x41   :  { %124 = vsyncpa [#allocation6], 1 }
  0x42   :  { %125 = vsyncpa [#allocation4], 1 }

</bundles_post_ra>
